<compile_context>
chip_gen: v5e
topology: v5e:2x2
jax: 0.10.0
libtpu: 0.0.40
codegen_flags: <defaults>
</compile_context>

<pallas_src>
import math
from functools import partial

import jax
import jax.numpy as jnp
import numpy as np
from jax.experimental import pallas as pl
from jax.experimental.pallas import tpu as pltpu


# ----------------------------------------------------------------------------
# Pallas kernels
# ----------------------------------------------------------------------------
def _density_conv_kernel(pm_ref, wf_ref, bias_ref, inv_ref, out_ref, *, n_conv):
    """Fused density + conv tile.

    y = patches @ W_fused   (cols <n_conv: conv, cols >=n_conv: z = x + masked_conv)
    Ex = 0.5 * sum_lanes(y^2 * inv_row)   (inv_row zero outside the z columns)
    out[:, :n_conv]  = y[:, :n_conv] + bias
    out[:, n_conv:]  = Ex (broadcast)     -> single unmasked 128-wide store.
    """
    y = jnp.dot(pm_ref[...], wf_ref[...],
                preferred_element_type=jnp.float32)             # [TM, NF] f32
    ex = 0.5 * jnp.sum(y * y * inv_ref[...], axis=1, keepdims=True)  # [TM, 1]
    col = jax.lax.broadcasted_iota(jnp.int32, y.shape, 1)
    out_ref[...] = jnp.where(col < n_conv, y + bias_ref[...], ex)


def _noise_kernel(a_ref, exp_ref, u_ref, svar_ref, bvar_ref, o_ref, *, d_channels):
    """a + sqrt(exp(s_lv)*clip(Ex_pool,0,D) + exp(b_lv)*D/2 + 1e-16) * U[0,1).

    Layout [1, C_out, TL] with TL (multiple of 128) on the lane axis.
    """
    ex_pool = jnp.clip(exp_ref[...], 0.0, d_channels)           # [1, 1, TL]
    noise_var = svar_ref[...] * ex_pool + bvar_ref[...] * (d_channels * 0.5)
    o_ref[...] = a_ref[...] + jnp.sqrt(noise_var + 1e-16) * u_ref[...]


# ----------------------------------------------------------------------------
# Glue: im2col, tiling helpers, pallas_call wrappers
# ----------------------------------------------------------------------------
def _round_up(n, m):
    return ((n + m - 1) // m) * m


def _vmem_capacity_bytes():
    """Physical VMEM per core (generation-aware); conservative fallback = v7x."""
    try:
        info = pltpu.get_tpu_info()
        cap = getattr(info, "vmem_capacity_bytes", None)
        if cap:
            return int(cap)
    except Exception:
        pass
    return 64 * 1024 * 1024


def _pick_tm(n_rows, kp, nf, requested, vmem_budget):
    """Largest row tile <= requested fitting the double-buffered VMEM budget.

    Byte estimate accounts for (8,128)/(16,128) lane padding of both streams:
    bf16 patch block (kp -> 128 lanes) + f32 fused-output block (nf -> 128 lanes),
    each double-buffered by the pipeline.
    """
    row_bytes = 2 * (_round_up(kp, 128) * 2 + _round_up(nf, 128) * 4)
    tm = min(requested, _round_up(n_rows, 16))
    tm = max(16, (tm // 16) * 16)
    while tm > 16 and tm * row_bytes > vmem_budget:
        tm = max(16, ((tm // 2) // 16) * 16)
    return tm


def _pad_rows(x, npad):
    n = x.shape[0]
    if npad > n:
        x = jnp.pad(x, ((0, npad - n),) + ((0, 0),) * (x.ndim - 1))
    return x


def _extract_patches_s1(xp, kh, kw, Ho, Wo):
    """Padded NHWC x -> stride-1 patches [B*Ho*Wo, kh*kw*C] (tap-major, ch-minor)."""
    B, _, _, C = xp.shape
    cols = []
    for ih in range(kh):
        for iw in range(kw):
            cols.append(xp[:, ih:ih + Ho, iw:iw + Wo, :])       # [B, Ho, Wo, C]
    patches = jnp.stack(cols, axis=3)                           # [B, Ho, Wo, kh*kw, C]
    return patches.reshape(B * Ho * Wo, kh * kw * C)


def _density_conv(pm, w_fused, bias_row, inv_row, *, c_out, tm, vmem_limit):
    """pm [N, KP] bf16, w_fused [KP, NF] bf16 -> fused output slab [N, NF] f32."""
    n, kp = pm.shape
    nf = w_fused.shape[1]
    tm = _pick_tm(n, kp, nf, requested=tm, vmem_budget=int(vmem_limit * 0.8))
    npad = _round_up(n, tm)
    pm_p = _pad_rows(pm, npad)
    kern = partial(_density_conv_kernel, n_conv=c_out)
    out = pl.pallas_call(
        kern,
        out_shape=jax.ShapeDtypeStruct((npad, nf), jnp.float32),
        grid=(npad // tm,),
        in_specs=[
            pl.BlockSpec((tm, kp), lambda i: (i, 0)),     # patches (streamed, bf16)
            pl.BlockSpec((kp, nf), lambda i: (0, 0)),     # fused weight (resident, bf16)
            pl.BlockSpec((1, nf), lambda i: (0, 0)),      # bias row (cols < c_out)
            pl.BlockSpec((1, nf), lambda i: (0, 0)),      # exp(-logvar) row (z cols)
        ],
        out_specs=pl.BlockSpec((tm, nf), lambda i: (i, 0)),
        compiler_params=pltpu.CompilerParams(
            dimension_semantics=("parallel",),
            vmem_limit_bytes=int(vmem_limit)),
    )(pm_p, w_fused, bias_row, inv_row)
    return out[:n]


def _noise_epilogue(a_nchw, ex_pool, u, svar, bvar, *, d_channels, tl=2048):
    B, c_out, L = a_nchw.shape
    TL = min(tl, _round_up(L, 128))
    Lp = _round_up(L, TL)

    def pad_l(t):
        return jnp.pad(t, ((0, 0), (0, 0), (0, Lp - L))) if Lp > L else t

    kern = partial(_noise_kernel, d_channels=d_channels)
    out = pl.pallas_call(
        kern,
        out_shape=jax.ShapeDtypeStruct((B, c_out, Lp), jnp.float32),
        grid=(B, Lp // TL),
        in_specs=[
            pl.BlockSpec((1, c_out, TL), lambda b, l: (b, 0, l)),
            pl.BlockSpec((1, 1, TL), lambda b, l: (b, 0, l)),
            pl.BlockSpec((1, c_out, TL), lambda b, l: (b, 0, l)),
            pl.BlockSpec((1, c_out, 1), lambda b, l: (0, 0, 0)),
            pl.BlockSpec((1, c_out, 1), lambda b, l: (0, 0, 0)),
        ],
        out_specs=pl.BlockSpec((1, c_out, TL), lambda b, l: (b, 0, l)),
        compiler_params=pltpu.CompilerParams(
            dimension_semantics=("parallel", "parallel")),
    )(pad_l(a_nchw), pad_l(ex_pool), pad_l(u), svar, bvar)
    return out[:, :, :L]


def density_conv2d_forward(x, params, cfg, noise_u, *, tm=None):
    """Forward of DensityConv2d.

    Args:
      x: [B, C_in, H, W] float32 (NCHW, like PyTorch).
      noise_u: U[0,1) noise, [B, C_out, Ho, Wo] (stand-in for torch.rand_like).
      tm: row tile for the fused density+conv kernel (None -> generation-aware).
    Returns:
      (a [B, C_out, Ho, Wo], loglikelihood [B]) — `a` is forward()'s return;
      loglikelihood is the attribute the module stores as a side effect.
    """
    B, C_in, H, W = x.shape
    kh, kw = cfg["kernel_size"]
    s, p = cfg["stride"], cfg["padding"]
    C_out = cfg["out_channels"]
    D = float(C_in)

    # The module requires the stride-1 masked conv to preserve spatial size
    # (z = x + masked_conv(x)), i.e. 2*padding == kernel_size - 1.
    if kh - 1 != 2 * p or kw - 1 != 2 * p:
        raise ValueError("DensityConv2d requires 2*padding == kernel_size - 1")

    vmem_cap = _vmem_capacity_bytes()
    vmem_limit = int(vmem_cap * 0.7)                 # ~45 MiB v7x, ~90 MiB v5e/v6e
    if tm is None:
        tm = 2048 if vmem_cap >= 96 * 1024 * 1024 else 1024

    x_nhwc = jnp.transpose(x, (0, 2, 3, 1)).astype(jnp.float32)
    xp = jnp.pad(x_nhwc, ((0, 0), (p, p), (p, p), (0, 0)))

    KP = kh * kw * C_in
    NF = _round_up(C_out + C_in, 128)                # lane-dense fused output width
    center_off = ((kh // 2) * kw + (kw // 2)) * C_in

    # im2col once, streamed in bf16 (dominant HBM stream halved vs f32).
    pm = _extract_patches_s1(xp, kh, kw, H, W).astype(jnp.bfloat16)  # [B*H*W, KP]

    # Host-side weight fusion: [conv | masked+I | 0-pad] -> one [KP, NF] slab.
    w_masked = params["w_masked"] * params["mask"]                    # [C_in, C_in, kh, kw]
    wm_mat = jnp.transpose(w_masked, (2, 3, 1, 0)).reshape(KP, C_in)
    wm_mat = wm_mat.at[center_off:center_off + C_in, :].add(
        jnp.eye(C_in, dtype=jnp.float32))                             # fold the "+x" tap
    wc_mat = jnp.transpose(params["w_conv"], (2, 3, 1, 0)).reshape(KP, C_out)
    w_fused = jnp.zeros((KP, NF), jnp.float32)
    w_fused = w_fused.at[:, :C_out].set(wc_mat)
    w_fused = w_fused.at[:, C_out:C_out + C_in].set(wm_mat)
    w_fused = w_fused.astype(jnp.bfloat16)

    bias_row = jnp.zeros((1, NF), jnp.float32).at[:, :C_out].set(
        params["bias"][None, :])
    inv_row = jnp.zeros((1, NF), jnp.float32).at[:, C_out:C_out + C_in].set(
        jnp.exp(-params["logvar"])[None, :])

    # Fused kernel: one lane-dense slab (cols <C_out: a_lin, cols >=C_out: Ex).
    slab = _density_conv(pm, w_fused, bias_row, inv_row,
                         c_out=C_out, tm=tm, vmem_limit=vmem_limit)   # [B*H*W, NF]
    a1_flat = slab[:, :C_out]                                         # stride-1 conv+bias
    ex_flat = slab[:, C_out:C_out + 1]                                # per-pixel Ex

    ex_img = ex_flat.reshape(B, H, W, 1)
    loglik = (-0.5 * (D * math.log(2.0 * math.pi) + jnp.sum(params["logvar"]))
              - jnp.mean(ex_img, axis=(1, 2, 3)))

    # AvgPool2d(kernel, stride, padding), count_include_pad=True: sum / (k*k).
    ex_sum = jax.lax.reduce_window(ex_img, 0.0, jax.lax.add,
                                   (1, kh, kw, 1), (1, s, s, 1),
                                   [(0, 0), (p, p), (p, p), (0, 0)])
    ex_pool = ex_sum * (1.0 / (kh * kw))                              # [B, Ho, Wo, 1]
    Ho, Wo = ex_pool.shape[1], ex_pool.shape[2]
    L = Ho * Wo

    # Strided conv == strided subsample of stride-1 conv (valid since 2p == k-1).
    a1 = a1_flat.reshape(B, H, W, C_out)
    a_nhwc = a1 if s == 1 else a1[:, ::s, ::s, :]
    assert a_nhwc.shape[1:3] == (Ho, Wo)

    a_nchw = jnp.transpose(a_nhwc, (0, 3, 1, 2)).reshape(B, C_out, L)
    ex_pool2 = ex_pool.reshape(B, 1, L)
    u2 = noise_u.astype(jnp.float32).reshape(B, C_out, L)
    svar = jnp.exp(params["s_logvar"]).reshape(1, C_out, 1)
    bvar = jnp.exp(params["b_logvar"]).reshape(1, C_out, 1)

    a_out = _noise_epilogue(a_nchw, ex_pool2, u2, svar, bvar, d_channels=D)
    return a_out.reshape(B, C_out, Ho, Wo), loglik


# ----------------------------------------------------------------------------
# Deterministic parameter init (shapes per DensityConv2d.__init__)
# ----------------------------------------------------------------------------
def init_params(key, in_channels, out_channels, kernel_size,
                posterior_std_init=0.001, bias=True):
    kh, kw = kernel_size
    k_conv, k_bias, k_masked = jax.random.split(key, 3)
    fan_in = in_channels * kh * kw
    # nn.init.kaiming_normal_ (fan_in, relu gain): std = sqrt(2 / fan_in)
    w_conv = jax.random.normal(k_conv, (out_channels, in_channels, kh, kw),
                               jnp.float32) * math.sqrt(2.0 / fan_in)
    b = (jax.random.uniform(k_bias, (out_channels,), jnp.float32,
                            minval=-1.0 / math.sqrt(fan_in),
                            maxval=1.0 / math.sqrt(fan_in))
         if bias else jnp.zeros((out_channels,), jnp.float32))
    # MaskedConv2d: C_in -> C_in conv, bias=False, PixelCNN type-A raster mask.
    w_masked = jax.random.normal(k_masked, (in_channels, in_channels, kh, kw),
                                 jnp.float32) * math.sqrt(2.0 / fan_in)
    mask = np.ones((in_channels, in_channels, kh, kw), np.float32)
    mask[:, :, kh // 2, kw // 2:] = 0.0
    mask[:, :, kh // 2 + 1:, :] = 0.0
    return dict(
        w_conv=w_conv,
        bias=b,
        w_masked=w_masked,
        mask=jnp.asarray(mask),
        logvar=jnp.zeros((in_channels,), jnp.float32),
        s_logvar=jnp.full((out_channels,), 2.0 * math.log(posterior_std_init),
                          jnp.float32),
        b_logvar=jnp.full((out_channels,), 2.0 * math.log(posterior_std_init),
                          jnp.float32),
    )


# ----------------------------------------------------------------------------
# Pure-JAX reference (lax.conv / reduce_window, HIGHEST precision) for checking
# ----------------------------------------------------------------------------
def _ref_forward(x, params, cfg, u):
    kh, kw = cfg["kernel_size"]
    s, p = cfg["stride"], cfg["padding"]
    C_in = x.shape[1]
    D = float(C_in)
    hp = jax.lax.Precision.HIGHEST
    wm = params["w_masked"] * params["mask"]
    z = x + jax.lax.conv_general_dilated(
        x, wm, (1, 1), [(p, p), (p, p)],
        dimension_numbers=("NCHW", "OIHW", "NCHW"), precision=hp)
    logvar = params["logvar"][None, :, None, None]
    Ex = jnp.sum(z * z / jnp.exp(logvar), axis=1, keepdims=True) / 2.0
    loglik = (-0.5 * (D * math.log(2.0 * math.pi) + jnp.sum(params["logvar"]))
              - jnp.mean(Ex, axis=(1, 2, 3)))
    Ex_sum = jax.lax.reduce_window(Ex, 0.0, jax.lax.add, (1, 1, kh, kw),
                                   (1, 1, s, s), [(0, 0), (0, 0), (p, p), (p, p)])
    Ex_pool = jnp.clip(Ex_sum / (kh * kw), 0.0, D)
    a = jax.lax.conv_general_dilated(
        x, params["w_conv"], (s, s), [(p, p), (p, p)],
        dimension_numbers=("NCHW", "OIHW", "NCHW"), precision=hp)
    a = a + params["bias"][None, :, None, None]
    noise_var = (jnp.exp(params["s_logvar"])[None, :, None, None] * Ex_pool
                 + jnp.exp(params["b_logvar"])[None, :, None, None] * D / 2.0)
    return a + jnp.sqrt(noise_var + 1e-16) * u, loglik


if __name__ == "__main__":
    B, C_in, H, W = 2, 4, 16, 16
    C_out, k, stride, pad = 8, (3, 3), 1, 1
    cfg = dict(out_channels=C_out, kernel_size=k, stride=stride, padding=pad)

    key = jax.random.PRNGKey(0)
    kx, ku, kparams = jax.random.split(key, 3)
    params = init_params(kparams, C_in, C_out, k)
    x = jax.random.normal(kx, (B, C_in, H, W), jnp.float32)
    Ho = (H + 2 * pad - k[0]) // stride + 1
    Wo = (W + 2 * pad - k[1]) // stride + 1
    u = jax.random.uniform(ku, (B, C_out, Ho, Wo), jnp.float32)

    a, loglik = density_conv2d_forward(x, params, cfg, u)
    a = jax.block_until_ready(a)
    loglik = jax.block_until_ready(loglik)

    # Kernel streams bf16 patches/weights through the MXU (f32 accumulate) while
    # the reference uses Precision.HIGHEST, so compare with a correspondingly
    # looser tolerance.
    a_ref, loglik_ref = _ref_forward(x, params, cfg, u)
    np.testing.assert_allclose(np.asarray(a), np.asarray(a_ref),
                               rtol=2e-2, atol=5e-2)
    np.testing.assert_allclose(np.asarray(loglik), np.asarray(loglik_ref),
                               rtol=2e-2, atol=5e-2)
    assert a.shape == (B, C_out, Ho, Wo)
    print("KERNEL_OK")
</pallas_src>

<mosaic_0001>
module attributes {stable_mosaic.version = 11 : i64} {
  func.func @_density_conv_kernel(%arg0: i32, %arg1: memref<512x36xbf16, #tpu.memory_space<vmem>>, %arg2: memref<36x128xbf16, #tpu.memory_space<vmem>>, %arg3: memref<1x128xf32, #tpu.memory_space<vmem>>, %arg4: memref<1x128xf32, #tpu.memory_space<vmem>>, %arg5: memref<512x128xf32, #tpu.memory_space<vmem>>) attributes {dimension_semantics = [#tpu.dimension_semantics<parallel>], iteration_bounds = array<i64: 1>, scalar_prefetch = 0 : i64, scratch_operands = 0 : i64, tpu.core_type = #tpu.core_type<tc>, window_params = [{transform_indices = @transform_0, window_bounds = array<i64: 512, 36>}, {pipeline_mode = #tpu.pipeline_mode<synchronous>, transform_indices = @transform_1, window_bounds = array<i64: 36, 128>}, {pipeline_mode = #tpu.pipeline_mode<synchronous>, transform_indices = @transform_2, window_bounds = array<i64: 1, 128>}, {pipeline_mode = #tpu.pipeline_mode<synchronous>, transform_indices = @transform_3, window_bounds = array<i64: 1, 128>}, {transform_indices = @transform_4, window_bounds = array<i64: 512, 128>}]} {
    %c0 = arith.constant 0 : index
    %c0_0 = arith.constant 0 : index
    %0 = vector.load %arg1[%c0, %c0_0] : memref<512x36xbf16, #tpu.memory_space<vmem>>, vector<512x36xbf16>
    %c0_1 = arith.constant 0 : index
    %c0_2 = arith.constant 0 : index
    %1 = vector.load %arg2[%c0_1, %c0_2] : memref<36x128xbf16, #tpu.memory_space<vmem>>, vector<36x128xbf16>
    %cst = arith.constant dense<0.000000e+00> : vector<512x128xf32>
    %2 = tpu.matmul %0, %1, %cst {dimension_numbers = #tpu.dot_dimension_numbers<[1], [0], [0], [1], [0, 0, 1, 1], [], []>} : vector<512x36xbf16>, vector<36x128xbf16>, vector<512x128xf32> -> vector<512x128xf32>
    %3 = arith.mulf %2, %2 : vector<512x128xf32>
    %c0_3 = arith.constant 0 : index
    %c0_4 = arith.constant 0 : index
    %4 = vector.load %arg4[%c0_3, %c0_4] : memref<1x128xf32, #tpu.memory_space<vmem>>, vector<1x128xf32>
    %5 = vector.broadcast %4 : vector<1x128xf32> to vector<512x128xf32>
    %6 = arith.mulf %3, %5 : vector<512x128xf32>
    %cst_5 = arith.constant dense<0.000000e+00> : vector<512xf32>
    %7 = vector.multi_reduction <add>, %6, %cst_5 [1] : vector<512x128xf32> to vector<512xf32>
    %8 = vector.shape_cast %7 : vector<512xf32> to vector<512x1xf32>
    %cst_6 = arith.constant 5.000000e-01 : f32
    %9 = vector.broadcast %cst_6 : f32 to vector<512x1xf32>
    %10 = arith.mulf %9, %8 : vector<512x1xf32>
    %11 = tpu.iota {dimensions = array<i32: 1>} : vector<512x128xi32>
    %c8_i32 = arith.constant 8 : i32
    %12 = vector.broadcast %c8_i32 : i32 to vector<512x128xi32>
    %13 = arith.cmpi slt, %11, %12 : vector<512x128xi32>
    %c0_7 = arith.constant 0 : index
    %c0_8 = arith.constant 0 : index
    %14 = vector.load %arg3[%c0_7, %c0_8] : memref<1x128xf32, #tpu.memory_space<vmem>>, vector<1x128xf32>
    %15 = vector.broadcast %14 : vector<1x128xf32> to vector<512x128xf32>
    %16 = arith.addf %2, %15 : vector<512x128xf32>
    %17 = vector.shape_cast %10 : vector<512x1xf32> to vector<512x1xf32>
    %18 = vector.broadcast %17 : vector<512x1xf32> to vector<512x128xf32>
    %19 = arith.select %13, %16, %18 : vector<512x128xi1>, vector<512x128xf32>
    %c0_9 = arith.constant 0 : index
    %c0_10 = arith.constant 0 : index
    %20 = vector.load %arg5[%c0_9, %c0_10] : memref<512x128xf32, #tpu.memory_space<vmem>>, vector<512x128xf32>
    tpu.vector_store %arg5[%c0_9, %c0_10], %19 {strides = array<i32>} : memref<512x128xf32, #tpu.memory_space<vmem>>, vector<512x128xf32>,
    return
  }
  func.func @transform_0(%arg0: i32) -> (i32, i32) {
    %c0_i32 = arith.constant 0 : i32
    %c0_i32_0 = arith.constant 0 : i32
    return %arg0, %c0_i32 : i32, i32
  }
  func.func @transform_1(%arg0: i32) -> (i32, i32) {
    %c0_i32 = arith.constant 0 : i32
    %c0_i32_0 = arith.constant 0 : i32
    %c0_i32_1 = arith.constant 0 : i32
    return %c0_i32, %c0_i32_0 : i32, i32
  }
  func.func @transform_2(%arg0: i32) -> (i32, i32) {
    %c0_i32 = arith.constant 0 : i32
    %c0_i32_0 = arith.constant 0 : i32
    %c0_i32_1 = arith.constant 0 : i32
    return %c0_i32, %c0_i32_0 : i32, i32
  }
  func.func @transform_3(%arg0: i32) -> (i32, i32) {
    %c0_i32 = arith.constant 0 : i32
    %c0_i32_0 = arith.constant 0 : i32
    %c0_i32_1 = arith.constant 0 : i32
    return %c0_i32, %c0_i32_0 : i32, i32
  }
  func.func @transform_4(%arg0: i32) -> (i32, i32) {
    %c0_i32 = arith.constant 0 : i32
    %c0_i32_0 = arith.constant 0 : i32
    return %arg0, %c0_i32 : i32, i32
  }
}

</mosaic_0001>

<bundles_post_ra>
// kernel: tpu_custom_call.1
= control target key start
LH: loop header
LB: loop body
LE: loop exit
PB: predicated region body
PF: predicated region fallthrough
CT: control target
= control target key end

     0   :  { %vm360_vm0 = vcmask 1041408   ;;  %s2073_s0 = inlined_call_operand.vmem [shape: bf16[512,36], index: 0, kind: input, shape index: {}]   ;;  %s2074_s1 = inlined_call_operand.vmem [shape: bf16[36,128], index: 1, kind: input, shape index: {}]   ;;  %s2075_s2 = inlined_call_operand.vmem [shape: f32[1,128], index: 2, kind: input, shape index: {}]   ;;  %s2076_s3 = inlined_call_operand.vmem [shape: f32[1,128], index: 3, kind: input, shape index: {}]   ;;  %s2077_s4 = inlined_call_operand.hbm [shape: f32[512,128], index: 4, kind: output, shape index: {}]  }
   0x1   :  { %v87_v0 = vld [vmem:[%s2074_s1 + $0x10] sm:$0x3] }
   0x2   :  { %v257_v1 = vunpack.c.l.b16 %v87_v0 }
   0x4   :  { %v260_v2 = vpack.c.b16 %v257_v1, %v257_v1 }
   0x5   :  { %9 = vsyncpa [#allocation3], 0  ;;  %v1275_v4 = vld [vmem:[%s2074_s1 + $0x8] sm:$0xff]  ;;  %v1274_v5 = vld [vmem:[%s2074_s1] sm:$0xff]  ;;  %vm263_vm1 = vcmask 293888   ;;  %s1062_s9 = sshll.u32 %s2077_s4, 4  ;;  %s1063_s9 = int_to_ptr.hbm [resolvable:$true] %s1062_s9 }
   0x6   :  { %v362_v3 = vsel %vm360_vm0, %v260_v2, 0  ;;  %v1242_v6 = vld [vmem:[%s2073_s0] sm:$0xff]  ;;  %v1243_v10 = vld [vmem:[%s2073_s0 + $0x8] sm:$0xff]  ;;  %v1244_v14 = vld [vmem:[%s2073_s0 + $0x10] sm:$0xff]  ;;  %s1317_s4 = smov 128   ;;  %s1318_s10 = smov 8  }
   0x7   :  { %369 = vmatpush.bf16.msra.mxu0 %v362_v3  ;;  %1276 = vmatpush.bf16.msra.mxu1 %v362_v3  ;;  %v1250_v7 = vld [vmem:[%s2073_s0 + $0x40] sm:$0xff]  ;;  %v1251_v11 = vld [vmem:[%s2073_s0 + $0x48] sm:$0xff]  ;;  %v1252_v15 = vld [vmem:[%s2073_s0 + $0x50] sm:$0xff] }
   0x8   :  { %1277 = vmatpush.bf16.msra.mxu2 %v362_v3  ;;  %1278 = vmatpush.bf16.msra.mxu3 %v362_v3  ;;  %v1258_v8 = vld [vmem:[%s2073_s0 + $0x80] sm:$0xff]  ;;  %v1259_v12 = vld [vmem:[%s2073_s0 + $0x88] sm:$0xff]  ;;  %v1260_v16 = vld [vmem:[%s2073_s0 + $0x90] sm:$0xff] }
   0x9   :  { %v1266_v9 = vld [vmem:[%s2073_s0 + $0xc0] sm:$0xff]  ;;  %v1267_v13 = vld [vmem:[%s2073_s0 + $0xc8] sm:$0xff]  ;;  %v1268_v17 = vld [vmem:[%s2073_s0 + $0xd0] sm:$0xff] }
   0xa   :  { %v1245_v18 = vld [vmem:[%s2073_s0 + $0x18] sm:$0xff]  ;;  %v1246_v22 = vld [vmem:[%s2073_s0 + $0x20] sm:$0xff]  ;;  %v1247_v26 = vld [vmem:[%s2073_s0 + $0x28] sm:$0xff] }
   0xb   :  { %370 = vmatpush.bf16.msra.mxu0 %v1275_v4  ;;  %1279 = vmatpush.bf16.msra.mxu1 %v1275_v4  ;;  %v1253_v19 = vld [vmem:[%s2073_s0 + $0x58] sm:$0xff]  ;;  %v1254_v23 = vld [vmem:[%s2073_s0 + $0x60] sm:$0xff]  ;;  %v1255_v27 = vld [vmem:[%s2073_s0 + $0x68] sm:$0xff] }
   0xc   :  { %1280 = vmatpush.bf16.msra.mxu2 %v1275_v4  ;;  %1281 = vmatpush.bf16.msra.mxu3 %v1275_v4  ;;  %v1261_v20 = vld [vmem:[%s2073_s0 + $0x98] sm:$0xff]  ;;  %v1262_v24 = vld [vmem:[%s2073_s0 + $0xa0] sm:$0xff]  ;;  %v1263_v28 = vld [vmem:[%s2073_s0 + $0xa8] sm:$0xff] }
   0xd   :  { %v1269_v21 = vld [vmem:[%s2073_s0 + $0xd8] sm:$0xff]  ;;  %v1270_v25 = vld [vmem:[%s2073_s0 + $0xe0] sm:$0xff]  ;;  %v1271_v29 = vld [vmem:[%s2073_s0 + $0xe8] sm:$0xff] }
   0xe   :  { %v1248_v30 = vld [vmem:[%s2073_s0 + $0x30] sm:$0xff]  ;;  %v1265_v34 = vld [vmem:[%s2073_s0 + $0xb8] sm:$0xff]  ;;  %v1484_v38 = vld [vmem:[%s2076_s3] ss:$0 sm:$0xff] }
   0xf   :  { %371 = vmatpush.bf16.msra.mxu0 %v1274_v5  ;;  %1282 = vmatpush.bf16.msra.mxu1 %v1274_v5  ;;  %v1264_v31 = vld [vmem:[%s2073_s0 + $0xb0] sm:$0xff]  ;;  %v1257_v35 = vld [vmem:[%s2073_s0 + $0x78] sm:$0xff] }
  0x10   :  { %1283 = vmatpush.bf16.msra.mxu2 %v1274_v5  ;;  %1284 = vmatpush.bf16.msra.mxu3 %v1274_v5  ;;  %v1272_v32 = vld [vmem:[%s2073_s0 + $0xf0] sm:$0xff]  ;;  %v1249_v36 = vld [vmem:[%s2073_s0 + $0x38] sm:$0xff] }
  0x11   :  { %v1256_v33 = vld [vmem:[%s2073_s0 + $0x70] sm:$0xff]  ;;  %v1273_v37 = vld [vmem:[%s2073_s0 + $0xf8] sm:$0xff] }
  0x12   :  { %1210 = vmatmul.msk.bf16.vlgmr.msra.gmra.mxu0 %vm263_vm1, %v1242_v6  ;;  %1218 = vmatmul.msk.bf16.vlgmr.msra.gmra.mxu1 %vm263_vm1, %v1250_v7 }
  0x13   :  { %1226 = vmatmul.msk.bf16.vlgmr.msra.gmra.mxu2 %vm263_vm1, %v1258_v8  ;;  %1234 = vmatmul.msk.bf16.vlgmr.msra.gmra.mxu3 %vm263_vm1, %v1266_v9 }
  0x22   :  { %1211 = vmatmul.msk.bf16.gmra.mxu0 %vm263_vm1, %v1243_v10  ;;  %1219 = vmatmul.msk.bf16.gmra.mxu1 %vm263_vm1, %v1251_v11 }
  0x23   :  { %1227 = vmatmul.msk.bf16.gmra.mxu2 %vm263_vm1, %v1259_v12  ;;  %1235 = vmatmul.msk.bf16.gmra.mxu3 %vm263_vm1, %v1267_v13 }
  0x32   :  { %1212 = vmatmul.msk.bf16.gmra.mxu0 %vm263_vm1, %v1244_v14  ;;  %1220 = vmatmul.msk.bf16.gmra.mxu1 %vm263_vm1, %v1252_v15 }
  0x33   :  { %1228 = vmatmul.msk.bf16.gmra.mxu2 %vm263_vm1, %v1260_v16  ;;  %1236 = vmatmul.msk.bf16.gmra.mxu3 %vm263_vm1, %v1268_v17 }
  0x42   :  { %1213 = vmatmul.msk.bf16.gmra.mxu0 %vm263_vm1, %v1245_v18  ;;  %1221 = vmatmul.msk.bf16.gmra.mxu1 %vm263_vm1, %v1253_v19 }
  0x43   :  { %1229 = vmatmul.msk.bf16.gmra.mxu2 %vm263_vm1, %v1261_v20  ;;  %1237 = vmatmul.msk.bf16.gmra.mxu3 %vm263_vm1, %v1269_v21 }
  0x52   :  { %1214 = vmatmul.msk.bf16.gmra.mxu0 %vm263_vm1, %v1246_v22  ;;  %1222 = vmatmul.msk.bf16.gmra.mxu1 %vm263_vm1, %v1254_v23 }
  0x53   :  { %1230 = vmatmul.msk.bf16.gmra.mxu2 %vm263_vm1, %v1262_v24  ;;  %1238 = vmatmul.msk.bf16.gmra.mxu3 %vm263_vm1, %v1270_v25 }
  0x62   :  { %1215 = vmatmul.msk.bf16.gmra.mxu0 %vm263_vm1, %v1247_v26  ;;  %1223 = vmatmul.msk.bf16.gmra.mxu1 %vm263_vm1, %v1255_v27 }
  0x63   :  { %1231 = vmatmul.msk.bf16.gmra.mxu2 %vm263_vm1, %v1263_v28  ;;  %1239 = vmatmul.msk.bf16.gmra.mxu3 %vm263_vm1, %v1271_v29 }
  0x72   :  { %1216 = vmatmul.msk.bf16.gmra.mxu0 %vm263_vm1, %v1248_v30  ;;  %1224 = vmatmul.msk.bf16.gmra.mxu1 %vm263_vm1, %v1256_v33 }
  0x73   :  { %1232 = vmatmul.msk.bf16.gmra.mxu2 %vm263_vm1, %v1264_v31  ;;  %1240 = vmatmul.msk.bf16.gmra.mxu3 %vm263_vm1, %v1272_v32 }
  0x82   :  { %1225 = vmatmul.msk.bf16.gmra.mxu1 %vm263_vm1, %v1257_v35  ;;  %1217 = vmatmul.msk.bf16.gmra.mxu0 %vm263_vm1, %v1249_v36 }
  0x83   :  { %1233 = vmatmul.msk.bf16.gmra.mxu2 %vm263_vm1, %v1265_v34  ;;  %1241 = vmatmul.msk.bf16.gmra.mxu3 %vm263_vm1, %v1273_v37 }
  0x8f   :  { %v1486_v39 = vpop.f32.mrf.mxu0  ;;  %v1488_v40 = vpop.f32.mrf.mxu1 }
  0x90   :  { %v533_v41 = vmul.f32 %v1486_v39, %v1486_v39  ;;  %v549_v42 = vmul.f32 %v1488_v40, %v1488_v40 }
  0x92   :  { %v617_v43 = vmul.f32 %v1484_v38, %v549_v42  ;;  %v601_v44 = vmul.f32 %v1484_v38, %v533_v41 }
  0x94   :  { %697 = vadd.xlane.f32.xlu1 %v617_v43  ;;  %665 = vadd.xlane.f32.xlu0 %v601_v44 }
  0x96   :  { %v1496_v45 = vpop.f32.mrf.mxu2  ;;  %v1498_v46 = vpop.f32.mrf.mxu3 }
  0x97   :  { %v565_v47 = vmul.f32 %v1496_v45, %v1496_v45  ;;  %v581_v48 = vmul.f32 %v1498_v46, %v1498_v46  ;;  %v1504_v49 = vpop.f32.mrf.mxu0  ;;  %v1508_v52 = vpop.f32.mrf.mxu1 }
  0x98   :  { %v550_v53 = vmul.f32 %v1508_v52, %v1508_v52  ;;  %v534_v54 = vmul.f32 %v1504_v49, %v1504_v49 }
  0x99   :  { %v633_v50 = vmul.f32 %v1484_v38, %v565_v47  ;;  %v649_v51 = vmul.f32 %v1484_v38, %v581_v48 }
  0x9a   :  { %v618_v60 = vmul.f32 %v1484_v38, %v550_v53  ;;  %v602_v61 = vmul.f32 %v1484_v38, %v534_v54 }
  0x9b   :  { %729 = vadd.xlane.f32.xlu2 %v633_v50 }
  0x9c   :  { %761 = vadd.xlane.f32.xlu0 %v649_v51 }
  0x9e   :  { %v1514_v55 = vpop.f32.mrf.mxu2  ;;  %v1516_v56 = vpop.f32.mrf.mxu3 }
  0x9f   :  { %v582_v57 = vmul.f32 %v1516_v56, %v1516_v56  ;;  %v1520_v58 = vpop.f32.mrf.mxu0  ;;  %v1527_v63 = vpop.f32.mrf.mxu1  ;;  %v566_v0 = vmul.f32 %v1514_v55, %v1514_v55 }
  0xa0   :  { %v535_v62 = vmul.f32 %v1520_v58, %v1520_v58  ;;  %v551_v8 = vmul.f32 %v1527_v63, %v1527_v63 }
  0xa1   :  { %v650_v59 = vmul.f32 %v1484_v38, %v582_v57  ;;  %v634_v7 = vmul.f32 %v1484_v38, %v566_v0 }
  0xa2   :  { %v603_v4 = vmul.f32 %v1484_v38, %v535_v62  ;;  %v619_v13 = vmul.f32 %v1484_v38, %v551_v8 }
  0xa3   :  { %763 = vadd.xlane.f32.xlu1 %v650_v59  ;;  %699 = vadd.xlane.f32.xlu2 %v618_v60 }
  0xa4   :  { %667 = vadd.xlane.f32.xlu0 %v602_v61 }
  0xa6   :  { %v1531_v1 = vpop.f32.mrf.mxu2  ;;  %v1533_v2 = vpop.f32.mrf.mxu3 }
  0xa7   :  { %v583_v3 = vmul.f32 %v1533_v2, %v1533_v2  ;;  %v1538_v5 = vpop.f32.mrf.mxu0  ;;  %v567_v9 = vmul.f32 %v1531_v1, %v1531_v1  ;;  %v1550_v12 = vpop.f32.mrf.mxu1 }
  0xa8   :  { %v536_v19 = vmul.f32 %v1538_v5, %v1538_v5  ;;  %v552_v28 = vmul.f32 %v1550_v12, %v1550_v12 }
  0xa9   :  { %v651_v6 = vmul.f32 %v1484_v38, %v583_v3  ;;  %v635_v15 = vmul.f32 %v1484_v38, %v567_v9 }
  0xaa   :  { %v604_v23 = vmul.f32 %v1484_v38, %v536_v19  ;;  %v620_v32 = vmul.f32 %v1484_v38, %v552_v28 }
  0xab   :  { %765 = vadd.xlane.f32.xlu2 %v651_v6  ;;  %669 = vadd.xlane.f32.xlu1 %v603_v4 }
  0xac   :  { %731 = vadd.xlane.f32.xlu0 %v634_v7 }
  0xae   :  { %v1546_v10 = vpop.f32.mrf.mxu2  ;;  %v1557_v17 = vpop.f32.mrf.mxu3 }
  0xaf   :  { %v568_v11 = vmul.f32 %v1546_v10, %v1546_v10  ;;  %v1555_v16 = vpop.f32.mrf.mxu0  ;;  %v584_v20 = vmul.f32 %v1557_v17, %v1557_v17  ;;  %v1566_v22 = vpop.f32.mrf.mxu1 }
  0xb0   :  { %v537_v18 = vmul.f32 %v1555_v16, %v1555_v16  ;;  %v553_v25 = vmul.f32 %v1566_v22, %v1566_v22 }
  0xb1   :  { %v636_v14 = vmul.f32 %v1484_v38, %v568_v11  ;;  %v652_v24 = vmul.f32 %v1484_v38, %v584_v20 }
  0xb2   :  { %v605_v21 = vmul.f32 %v1484_v38, %v537_v18  ;;  %v621_v30 = vmul.f32 %v1484_v38, %v553_v25 }
  0xb3   :  { %735 = vadd.xlane.f32.xlu2 %v636_v14  ;;  %733 = vadd.xlane.f32.xlu1 %v635_v15 }
  0xb4   :  { %701 = vadd.xlane.f32.xlu0 %v619_v13 }
  0xb6   :  { %v1572_v26 = vpop.f32.mrf.mxu2  ;;  %v1578_v29 = vpop.f32.mrf.mxu3 }
  0xb7   :  { %v569_v27 = vmul.f32 %v1572_v26, %v1572_v26  ;;  %v1583_v33 = vpop.f32.mrf.mxu0  ;;  %v1585_v34 = vpop.f32.mrf.mxu1  ;;  %v585_v35 = vmul.f32 %v1578_v29, %v1578_v29 }
  0xb8   :  { %v538_v36 = vmul.f32 %v1583_v33, %v1583_v33  ;;  %v554_v37 = vmul.f32 %v1585_v34, %v1585_v34 }
  0xb9   :  { %v637_v31 = vmul.f32 %v1484_v38, %v569_v27  ;;  %v653_v41 = vmul.f32 %v1484_v38, %v585_v35 }
  0xba   :  { %v606_v44 = vmul.f32 %v1484_v38, %v538_v36  ;;  %v622_v47 = vmul.f32 %v1484_v38, %v554_v37 }
  0xbb   :  { %671 = vadd.xlane.f32.xlu1 %v604_v23  ;;  %673 = vadd.xlane.f32.xlu2 %v605_v21 }
  0xbc   :  { %767 = vadd.xlane.f32.xlu0 %v652_v24 }
  0xbe   :  { %v1594_v42 = vpop.f32.mrf.mxu2  ;;  %v1596_v43 = vpop.f32.mrf.mxu3 }
  0xbf   :  { %v1600_v48 = vpop.f32.mrf.mxu0  ;;  %v570_v51 = vmul.f32 %v1594_v42, %v1594_v42  ;;  %v586_v53 = vmul.f32 %v1596_v43, %v1596_v43  ;;  %v1608_v54 = vpop.f32.mrf.mxu1 }
  0xc0   :  { %v539_v50 = vmul.f32 %v1600_v48, %v1600_v48  ;;  %v555_v62 = vmul.f32 %v1608_v54, %v1608_v54 }
  0xc1   :  { %v638_v60 = vmul.f32 %v1484_v38, %v570_v51  ;;  %v654_v61 = vmul.f32 %v1484_v38, %v586_v53 }
  0xc2   :  { %v607_v57 = vmul.f32 %v1484_v38, %v539_v50  ;;  %v623_v6 = vmul.f32 %v1484_v38, %v555_v62 }
  0xc3   :  { %703 = vadd.xlane.f32.xlu1 %v620_v32  ;;  %705 = vadd.xlane.f32.xlu2 %v621_v30 }
  0xc4   :  { %737 = vadd.xlane.f32.xlu0 %v637_v31 }
  0xc6   :  { %v1611_v59 = vpop.f32.mrf.mxu2  ;;  %v1619_v3 = vpop.f32.mrf.mxu3 }
  0xc7   :  { %v571_v0 = vmul.f32 %v1611_v59, %v1611_v59  ;;  %v587_v4 = vmul.f32 %v1619_v3, %v1619_v3  ;;  %v1626_v9 = vpop.f32.mrf.mxu0  ;;  %v1628_v11 = vpop.f32.mrf.mxu1 }
  0xc8   :  { %v540_v14 = vmul.f32 %v1626_v9, %v1626_v9  ;;  %v556_v15 = vmul.f32 %v1628_v11, %v1628_v11 }
  0xc9   :  { %v639_v7 = vmul.f32 %v1484_v38, %v571_v0  ;;  %v655_v8 = vmul.f32 %v1484_v38, %v587_v4 }
  0xca   :  { %v624_v21 = vmul.f32 %v1484_v38, %v556_v15  ;;  %v608_v23 = vmul.f32 %v1484_v38, %v540_v14 }
  0xcb   :  { %769 = vadd.xlane.f32.xlu1 %v653_v41  ;;  %675 = vadd.xlane.f32.xlu2 %v606_v44 }
  0xcc   :  { %707 = vadd.xlane.f32.xlu0 %v622_v47 }
  0xce   :  { %v1630_v13 = vpop.f32.mrf.mxu2  ;;  %v1638_v19 = vpop.f32.mrf.mxu3 }
  0xcf   :  { %v572_v18 = vmul.f32 %v1630_v13, %v1630_v13  ;;  %v1640_v20 = vpop.f32.mrf.mxu0  ;;  %v1647_v27 = vpop.f32.mrf.mxu1  ;;  %v588_v30 = vmul.f32 %v1638_v19, %v1638_v19 }
  0xd0   :  { %v541_v25 = vmul.f32 %v1640_v20, %v1640_v20  ;;  %v557_v28 = vmul.f32 %v1647_v27, %v1647_v27 }
  0xd1   :  { %v640_v24 = vmul.f32 %v1484_v38, %v572_v18  ;;  %v656_v37 = vmul.f32 %v1484_v38, %v588_v30 }
  0xd2   :  { %v609_v32 = vmul.f32 %v1484_v38, %v541_v25  ;;  %v625_v35 = vmul.f32 %v1484_v38, %v557_v28 }
  0xd3   :  { %739 = vadd.xlane.f32.xlu1 %v638_v60  ;;  %771 = vadd.xlane.f32.xlu2 %v654_v61 }
  0xd4   :  { %677 = vadd.xlane.f32.xlu0 %v607_v57 }
  0xd6   :  { %v1653_v31 = vpop.f32.mrf.mxu2  ;;  %v1657_v36 = vpop.f32.mrf.mxu3 }
  0xd7   :  { %v1660_v41 = vpop.f32.mrf.mxu0  ;;  %v573_v44 = vmul.f32 %v1653_v31, %v1653_v31  ;;  %v589_v47 = vmul.f32 %v1657_v36, %v1657_v36  ;;  %v1672_v60 = vpop.f32.mrf.mxu1 }
  0xd8   :  { %v542_v50 = vmul.f32 %v1660_v41, %v1660_v41  ;;  %v558_v0 = vmul.f32 %v1672_v60, %v1672_v60 }
  0xd9   :  { %v641_v53 = vmul.f32 %v1484_v38, %v573_v44  ;;  %v657_v57 = vmul.f32 %v1484_v38, %v589_v47 }
  0xda   :  { %v610_v61 = vmul.f32 %v1484_v38, %v542_v50  ;;  %v626_v15 = vmul.f32 %v1484_v38, %v558_v0 }
  0xdb   :  { %709 = vadd.xlane.f32.xlu1 %v623_v6  ;;  %741 = vadd.xlane.f32.xlu2 %v639_v7 }
  0xdc   :  { %773 = vadd.xlane.f32.xlu0 %v655_v8 }
  0xde   :  { %v1668_v51 = vpop.f32.mrf.mxu2  ;;  %v1675_v62 = vpop.f32.mrf.mxu3 }
  0xdf   :  { %v574_v4 = vmul.f32 %v1668_v51, %v1668_v51  ;;  %v590_v6 = vmul.f32 %v1675_v62, %v1675_v62  ;;  %v1683_v7 = vpop.f32.mrf.mxu0  ;;  %v1685_v8 = vpop.f32.mrf.mxu1 }
  0xe1   :  { %v642_v18 = vmul.f32 %v1484_v38, %v574_v4 }
  0xe3   :  { %711 = vadd.xlane.f32.xlu2 %v624_v21  ;;  %679 = vadd.xlane.f32.xlu1 %v608_v23  ;;  %v658_v21 = vmul.f32 %v1484_v38, %v590_v6  ;;  %v543_v23 = vmul.f32 %v1683_v7, %v1683_v7 }
  0xe4   :  { %743 = vadd.xlane.f32.xlu0 %v640_v24  ;;  %v559_v24 = vmul.f32 %v1685_v8, %v1685_v8 }
  0xe6   :  { %v1687_v14 = vpop.f32.mrf.mxu2  ;;  %v1698_v28 = vpop.f32.mrf.mxu3  ;;  %v627_v30 = vmul.f32 %v1484_v38, %v559_v24 }
  0xe7   :  { %v575_v25 = vmul.f32 %v1687_v14, %v1687_v14  ;;  %v1705_v47 = vpop.f32.mrf.mxu1 }
  0xe8   :  { %2083 = vst [vmem:[#allocation5_spill] sm:$0xff] %v1705_v47  ;;  %v560_v4 = vmul.f32 %v1705_v47, %v1705_v47 }
  0xe9   :  { %v643_v44 = vmul.f32 %v1484_v38, %v575_v25 }
  0xeb   :  { %775 = vadd.xlane.f32.xlu1 %v656_v37  ;;  %681 = vadd.xlane.f32.xlu2 %v609_v32  ;;  %v611_v32 = vmul.f32 %v1484_v38, %v543_v23  ;;  %v1702_v37 = vpop.f32.mrf.mxu0 }
  0xec   :  { %713 = vadd.xlane.f32.xlu0 %v625_v35  ;;  %v857_v35 = vlaneseq  ;;  %v544_v0 = vmul.f32 %v1702_v37, %v1702_v37 }
  0xee   :  { %v1707_v50 = vpop.f32.mrf.mxu2 }
  0xf3   :  { %745 = vadd.xlane.f32.xlu1 %v641_v53  ;;  %777 = vadd.xlane.f32.xlu2 %v657_v57  ;;  %v591_v53 = vmul.f32 %v1698_v28, %v1698_v28  ;;  %v1711_v57 = vand.u32 127, %v857_v35  ;;  %v1735_v47 = vpop.f32.mrf.mxu0 }
  0xf4   :  { %683 = vadd.xlane.f32.xlu0 %v610_v61  ;;  %v1716_v61 = vld [vmem:[%s2075_s2] ss:$0 sm:$0xff]  ;;  %2084 = vst [vmem:[#allocation6_spill] sm:$0xff] %v1735_v47  ;;  %s1316_s2 = smov [#allocation2]  }
  0xf5   :  { %vm859_vm2 = vcmp.lt.s32.totalorder %v1711_v57, 8  ;;  %v880_v23 = vadd.f32 %v1716_v61, %v1488_v40  ;;  %s1060_s6 = sshll.u32 %s1316_s2, 4  ;;  %s1061_s6 = int_to_ptr.vmem [resolvable:$true] %s1060_s6 }
  0xf6   :  { %v1740_v40 = vpop.f32.mrf.mxu2 }
  0xf7   :  { %2086 = vst [vmem:[#allocation8_spill] sm:$0xff] %v1740_v40 }
  0xfb   :  { %715 = vadd.xlane.f32.xlu1 %v626_v15  ;;  %747 = vadd.xlane.f32.xlu2 %v642_v18  ;;  %v659_v18 = vmul.f32 %v1484_v38, %v591_v53  ;;  %v628_v53 = vmul.f32 %v1484_v38, %v560_v4  ;;  %v896_v4 = vadd.f32 %v1716_v61, %v1496_v45 }
  0xfc   :  { %779 = vadd.xlane.f32.xlu0 %v658_v21  ;;  %v864_v21 = vadd.f32 %v1716_v61, %v1486_v39  ;;  %v1738_v39 = vpop.f32.mrf.mxu1 }
  0xfd   :  { %2085 = vst [vmem:[#allocation7_spill] sm:$0xff] %v1738_v39  ;;  %v561_v45 = vmul.f32 %v1738_v39, %v1738_v39  ;;  %v1780_v39 = vpop.f32.mrf.mxu0 }
 0x103   :  { %717 = vadd.xlane.f32.xlu2 %v627_v30  ;;  %685 = vadd.xlane.f32.xlu1 %v611_v32  ;;  %v1728_v30 = vpop.f32.mrf.mxu3  ;;  %v612_v32 = vmul.f32 %v1484_v38, %v544_v0  ;;  %v545_v0 = vmul.f32 %v1735_v47, %v1735_v47 }
 0x104   :  { %749 = vadd.xlane.f32.xlu0 %v643_v44 }
 0x107   :  { %v698_v6 = vpop.xlane.xlu1 %697  ;;  %v666_v15 = vpop.xlane.xlu0 %665 }
 0x108   :  { %v809_v24 = vmul.f32 0.5, %v698_v6  ;;  %v793_v25 = vmul.f32 0.5, %v666_v15  ;;  %v576_v6 = vmul.f32 %v1707_v50, %v1707_v50  ;;  %v592_v15 = vmul.f32 %v1728_v30, %v1728_v30 }
 0x10a   :  { %v944_v35 = vsel %vm859_vm2, %v880_v23, %v809_v24  ;;  %v928_v44 = vsel %vm859_vm2, %v864_v21, %v793_v25  ;;  %v912_v24 = vadd.f32 %v1716_v61, %v1498_v46  ;;  %v577_v46 = vmul.f32 %v1740_v40, %v1740_v40 }
 0x10b   :  { %1008 = vst [vmem:[#allocation2 + $0x80] sm:$0xff] %v944_v35  ;;  %781 = vadd.xlane.f32.xlu1 %v659_v18  ;;  %687 = vadd.xlane.f32.xlu2 %v612_v32  ;;  %v613_v32 = vmul.f32 %v1484_v38, %v545_v0 }
 0x10c   :  { %992 = vst [vmem:[#allocation2] sm:$0xff] %v928_v44  ;;  %719 = vadd.xlane.f32.xlu0 %v628_v53  ;;  %v644_v44 = vmul.f32 %v1484_v38, %v576_v6  ;;  %v660_v53 = vmul.f32 %v1484_v38, %v592_v15  ;;  %v1767_v6 = vpop.f32.mrf.mxu1  ;;  %v1769_v15 = vpop.f32.mrf.mxu2 }
 0x10e   :  { %v730_v21 = vpop.xlane.xlu2 %729 }
 0x10f   :  { %v825_v18 = vmul.f32 0.5, %v730_v21  ;;  %v762_v23 = vpop.xlane.xlu0 %761  ;;  %v1763_v21 = vpop.f32.mrf.mxu3 }
 0x110   :  { %v841_v25 = vmul.f32 0.5, %v762_v23  ;;  %2087 = vst [vmem:[#allocation9_spill] sm:$0xff] %v1763_v21  ;;  %v593_v0 = vmul.f32 %v1763_v21, %v1763_v21 }
 0x111   :  { %v960_v35 = vsel %vm859_vm2, %v896_v4, %v825_v18  ;;  %v881_v4 = vadd.f32 %v1716_v61, %v1508_v52  ;;  %v913_v18 = vadd.f32 %v1716_v61, %v1516_v56 }
 0x112   :  { %1024 = vst [vmem:[#allocation2 + $0x100] sm:$0xff] %v960_v35  ;;  %v976_v47 = vsel %vm859_vm2, %v912_v24, %v841_v25  ;;  %v661_v40 = vmul.f32 %v1484_v38, %v593_v0  ;;  %v578_v0 = vmul.f32 %v1769_v15, %v1769_v15 }
 0x113   :  { %1040 = vst [vmem:[#allocation2 + $0x180] sm:$0xff] %v976_v47  ;;  %751 = vadd.xlane.f32.xlu1 %v644_v44  ;;  %783 = vadd.xlane.f32.xlu2 %v660_v53  ;;  %v629_v44 = vmul.f32 %v1484_v38, %v561_v45  ;;  %v645_v53 = vmul.f32 %v1484_v38, %v577_v46 }
 0x114   :  { %689 = vadd.xlane.f32.xlu0 %v613_v32  ;;  %v865_v32 = vadd.f32 %v1716_v61, %v1504_v49  ;;  %v546_v49 = vmul.f32 %v1780_v39, %v1780_v39  ;;  %v562_v46 = vmul.f32 %v1767_v6, %v1767_v6 }
 0x116   :  { %v764_v23 = vpop.xlane.xlu1 %763  ;;  %v700_v24 = vpop.xlane.xlu2 %699 }
 0x117   :  { %v842_v25 = vmul.f32 0.5, %v764_v23  ;;  %v810_v47 = vmul.f32 0.5, %v700_v24  ;;  %v668_v35 = vpop.xlane.xlu0 %667  ;;  %v866_v23 = vadd.f32 %v1716_v61, %v1520_v58 }
 0x118   :  { %v794_v21 = vmul.f32 0.5, %v668_v35  ;;  %v1800_v35 = vpop.f32.mrf.mxu1 }
 0x119   :  { %v977_v52 = vsel %vm859_vm2, %v913_v18, %v842_v25  ;;  %v945_v56 = vsel %vm859_vm2, %v881_v4, %v810_v47  ;;  %v897_v47 = vadd.f32 %v1716_v61, %v1514_v55 }
 0x11a   :  { %1041 = vst [vmem:[#allocation2 + $0x188] sm:$0xff] %v977_v52  ;;  %v929_v45 = vsel %vm859_vm2, %v865_v32, %v794_v21  ;;  %v914_v21 = vadd.f32 %v1716_v61, %v1533_v2  ;;  %v1804_v32 = vpop.f32.mrf.mxu3  ;;  %v1810_v2 = vpop.f32.mrf.mxu0 }
 0x11b   :  { %1009 = vst [vmem:[#allocation2 + $0x88] sm:$0xff] %v945_v56  ;;  %721 = vadd.xlane.f32.xlu1 %v629_v44  ;;  %753 = vadd.xlane.f32.xlu2 %v645_v53  ;;  %v1802_v44 = vpop.f32.mrf.mxu2  ;;  %v630_v56 = vmul.f32 %v1484_v38, %v562_v46  ;;  %v563_v46 = vmul.f32 %v1800_v35, %v1800_v35 }
 0x11c   :  { %993 = vst [vmem:[#allocation2 + $0x8] sm:$0xff] %v929_v45  ;;  %785 = vadd.xlane.f32.xlu0 %v661_v40  ;;  %v614_v45 = vmul.f32 %v1484_v38, %v546_v49  ;;  %v898_v49 = vadd.f32 %v1716_v61, %v1531_v1 }
 0x11e   :  { %v766_v18 = vpop.xlane.xlu2 %765  ;;  %v670_v4 = vpop.xlane.xlu1 %669 }
 0x11f   :  { %v843_v24 = vmul.f32 0.5, %v766_v18  ;;  %v795_v25 = vmul.f32 0.5, %v670_v4  ;;  %v732_v40 = vpop.xlane.xlu0 %731  ;;  %v646_v18 = vmul.f32 %v1484_v38, %v578_v0  ;;  %v579_v4 = vmul.f32 %v1802_v44, %v1802_v44 }
 0x120   :  { %v826_v53 = vmul.f32 0.5, %v732_v40  ;;  %v899_v0 = vadd.f32 %v1716_v61, %v1546_v10 }
 0x121   :  { %v978_v52 = vsel %vm859_vm2, %v914_v21, %v843_v24  ;;  %v930_v58 = vsel %vm859_vm2, %v866_v23, %v795_v25  ;;  %v547_v21 = vmul.f32 %v1810_v2, %v1810_v2 }
 0x122   :  { %1042 = vst [vmem:[#allocation2 + $0x190] sm:$0xff] %v978_v52  ;;  %v961_v55 = vsel %vm859_vm2, %v897_v47, %v826_v53  ;;  %v647_v53 = vmul.f32 %v1484_v38, %v579_v4 }
 0x123   :  { %994 = vst [vmem:[#allocation2 + $0x10] sm:$0xff] %v930_v58  ;;  %723 = vadd.xlane.f32.xlu2 %v630_v56  ;;  %691 = vadd.xlane.f32.xlu1 %v614_v45  ;;  %v615_v52 = vmul.f32 %v1484_v38, %v547_v21  ;;  %v882_v58 = vadd.f32 %v1716_v61, %v1527_v63  ;;  %v1840_v4 = vpop.f32.mrf.mxu2  ;;  %v1844_v63 = vpop.f32.mrf.mxu0 }
 0x124   :  { %1025 = vst [vmem:[#allocation2 + $0x108] sm:$0xff] %v961_v55  ;;  %755 = vadd.xlane.f32.xlu0 %v646_v18  ;;  %v631_v45 = vmul.f32 %v1484_v38, %v563_v46  ;;  %v1836_v55 = vpop.f32.mrf.mxu3  ;;  %v1838_v18 = vpop.f32.mrf.mxu1 }
 0x125   :  { %v564_v46 = vmul.f32 %v1838_v18, %v1838_v18 }
 0x126   :  { %v736_v23 = vpop.xlane.xlu2 %735  ;;  %v734_v24 = vpop.xlane.xlu1 %733 }
 0x127   :  { %v828_v25 = vmul.f32 0.5, %v736_v23  ;;  %v827_v40 = vmul.f32 0.5, %v734_v24  ;;  %v702_v47 = vpop.xlane.xlu0 %701 }
 0x128   :  { %v811_v56 = vmul.f32 0.5, %v702_v47 }
 0x129   :  { %v963_v1 = vsel %vm859_vm2, %v899_v0, %v828_v25  ;;  %v962_v10 = vsel %vm859_vm2, %v898_v49, %v827_v40  ;;  %v580_v49 = vmul.f32 %v1840_v4, %v1840_v4  ;;  %v548_v0 = vmul.f32 %v1844_v63, %v1844_v63 }
 0x12a   :  { %1027 = vst [vmem:[#allocation2 + $0x118] sm:$0xff] %v963_v1  ;;  %v946_v21 = vsel %vm859_vm2, %v882_v58, %v811_v56  ;;  %v867_v25 = vadd.f32 %v1716_v61, %v1538_v5  ;;  %v868_v40 = vadd.f32 %v1716_v61, %v1555_v16  ;;  %v915_v58 = vadd.f32 %v1716_v61, %v1557_v17 }
 0x12b   :  { %1026 = vst [vmem:[#allocation2 + $0x110] sm:$0xff] %v962_v10  ;;  %757 = vadd.xlane.f32.xlu1 %v647_v53  ;;  %693 = vadd.xlane.f32.xlu2 %v615_v52  ;;  %v632_v10 = vmul.f32 %v1484_v38, %v564_v46  ;;  %v648_v5 = vmul.f32 %v1484_v38, %v580_v49 }
 0x12c   :  { %1010 = vst [vmem:[#allocation2 + $0x90] sm:$0xff] %v946_v21  ;;  %725 = vadd.xlane.f32.xlu0 %v631_v45  ;;  %v616_v21 = vmul.f32 %v1484_v38, %v548_v0  ;;  %v594_v17 = vmul.f32 %v1804_v32, %v1804_v32  ;;  %v595_v46 = vmul.f32 %v1836_v55, %v1836_v55 }
 0x12d   :  { %v883_v0 = vadd.f32 %v1716_v61, %v1550_v12 }
 0x12e   :  { %v672_v23 = vpop.xlane.xlu1 %671  ;;  %v674_v24 = vpop.xlane.xlu2 %673  ;;  %v663_v12 = vmul.f32 %v1484_v38, %v595_v46 }
 0x12f   :  { %v796_v47 = vmul.f32 0.5, %v672_v23  ;;  %v797_v53 = vmul.f32 0.5, %v674_v24  ;;  %v768_v52 = vpop.xlane.xlu0 %767  ;;  %v1867_v23 = vpop.f32.mrf.mxu3 }
 0x130   :  { %v844_v56 = vmul.f32 0.5, %v768_v52  ;;  %v596_v49 = vmul.f32 %v1867_v23, %v1867_v23 }
 0x131   :  { %v931_v45 = vsel %vm859_vm2, %v867_v25, %v796_v47  ;;  %v932_v1 = vsel %vm859_vm2, %v868_v40, %v797_v53  ;;  %v884_v40 = vadd.f32 %v1716_v61, %v1566_v22 }
 0x132   :  { %995 = vst [vmem:[#allocation2 + $0x18] sm:$0xff] %v931_v45  ;;  %v979_v16 = vsel %vm859_vm2, %v915_v58, %v844_v56  ;;  %v900_v58 = vadd.f32 %v1716_v61, %v1572_v26 }
 0x133   :  { %996 = vst [vmem:[#allocation2 + $0x20] sm:$0xff] %v932_v1  ;;  %727 = vadd.xlane.f32.xlu1 %v632_v10  ;;  %759 = vadd.xlane.f32.xlu2 %v648_v5  ;;  %v662_v10 = vmul.f32 %v1484_v38, %v594_v17  ;;  %v664_v5 = vmul.f32 %v1484_v38, %v596_v49 }
 0x134   :  { %1043 = vst [vmem:[#allocation2 + $0x198] sm:$0xff] %v979_v16  ;;  %695 = vadd.xlane.f32.xlu0 %v616_v21  ;;  %v869_v21 = vadd.f32 %v1716_v61, %v1583_v33  ;;  %v916_v17 = vadd.f32 %v1716_v61, %v1578_v29 }
 0x136   :  { %v704_v24 = vpop.xlane.xlu1 %703  ;;  %v706_v25 = vpop.xlane.xlu2 %705 }
 0x137   :  { %v812_v47 = vmul.f32 0.5, %v704_v24  ;;  %v813_v53 = vmul.f32 0.5, %v706_v25  ;;  %v738_v52 = vpop.xlane.xlu0 %737 }
 0x138   :  { %v829_v56 = vmul.f32 0.5, %v738_v52 }
 0x139   :  { %v947_v45 = vsel %vm859_vm2, %v883_v0, %v812_v47  ;;  %v948_v1 = vsel %vm859_vm2, %v884_v40, %v813_v53  ;;  %v885_v0 = vadd.f32 %v1716_v61, %v1585_v34  ;;  %v901_v53 = vadd.f32 %v1716_v61, %v1594_v42 }
 0x13a   :  { %1011 = vst [vmem:[#allocation2 + $0x98] sm:$0xff] %v947_v45  ;;  %v964_v22 = vsel %vm859_vm2, %v900_v58, %v829_v56  ;;  %v917_v34 = vadd.f32 %v1716_v61, %v1596_v43  ;;  %v870_v45 = vadd.f32 %v1716_v61, %v1600_v48  ;;  %v902_v48 = vadd.f32 %v1716_v61, %v1611_v59 }
 0x13b   :  { %1012 = vst [vmem:[#allocation2 + $0xa0] sm:$0xff] %v948_v1  ;;  %787 = vadd.xlane.f32.xlu1 %v662_v10  ;;  %789 = vadd.xlane.f32.xlu2 %v663_v12 }
 0x13c   :  { %1028 = vst [vmem:[#allocation2 + $0x120] sm:$0xff] %v964_v22  ;;  %791 = vadd.xlane.f32.xlu0 %v664_v5  ;;  %v886_v5 = vadd.f32 %v1716_v61, %v1608_v54 }
 0x13e   :  { %v770_v26 = vpop.xlane.xlu1 %769  ;;  %v676_v16 = vpop.xlane.xlu2 %675 }
 0x13f   :  { %v845_v46 = vmul.f32 0.5, %v770_v26  ;;  %v798_v24 = vmul.f32 0.5, %v676_v16  ;;  %v708_v25 = vpop.xlane.xlu0 %707 }
 0x140   :  { %v814_v38 = vmul.f32 0.5, %v708_v25 }
 0x141   :  { %v980_v49 = vsel %vm859_vm2, %v916_v17, %v845_v46  ;;  %v933_v40 = vsel %vm859_vm2, %v869_v21, %v798_v24  ;;  %v918_v17 = vadd.f32 %v1716_v61, %v1619_v3  ;;  %v887_v3 = vadd.f32 %v1716_v61, %v1628_v11 }
 0x142   :  { %1044 = vst [vmem:[#allocation2 + $0x1a0] sm:$0xff] %v980_v49  ;;  %v949_v33 = vsel %vm859_vm2, %v885_v0, %v814_v38  ;;  %v871_v38 = vadd.f32 %v1716_v61, %v1626_v9 }
 0x143   :  { %997 = vst [vmem:[#allocation2 + $0x28] sm:$0xff] %v933_v40 }
 0x144   :  { %1013 = vst [vmem:[#allocation2 + $0xa8] sm:$0xff] %v949_v33 }
 0x146   :  { %v740_v29 = vpop.xlane.xlu1 %739  ;;  %v772_v47 = vpop.xlane.xlu2 %771 }
 0x147   :  { %v830_v52 = vmul.f32 0.5, %v740_v29  ;;  %v846_v58 = vmul.f32 0.5, %v772_v47  ;;  %v678_v56 = vpop.xlane.xlu0 %677  ;;  %v903_v29 = vadd.f32 %v1716_v61, %v1630_v13  ;;  %v872_v13 = vadd.f32 %v1716_v61, %v1640_v20 }
 0x148   :  { %v799_v1 = vmul.f32 0.5, %v678_v56 }
 0x149   :  { %v965_v10 = vsel %vm859_vm2, %v901_v53, %v830_v52  ;;  %v981_v12 = vsel %vm859_vm2, %v917_v34, %v846_v58  ;;  %v919_v58 = vadd.f32 %v1716_v61, %v1638_v19 }
 0x14a   :  { %1029 = vst [vmem:[#allocation2 + $0x128] sm:$0xff] %v965_v10  ;;  %v934_v42 = vsel %vm859_vm2, %v870_v45, %v799_v1  ;;  %v888_v10 = vadd.f32 %v1716_v61, %v1647_v27  ;;  %v920_v27 = vadd.f32 %v1716_v61, %v1657_v36 }
 0x14b   :  { %1045 = vst [vmem:[#allocation2 + $0x1a8] sm:$0xff] %v981_v12 }
 0x14c   :  { %998 = vst [vmem:[#allocation2 + $0x30] sm:$0xff] %v934_v42 }
 0x14e   :  { %v710_v43 = vpop.xlane.xlu1 %709  ;;  %v742_v22 = vpop.xlane.xlu2 %741 }
 0x14f   :  { %v815_v26 = vmul.f32 0.5, %v710_v43  ;;  %v831_v16 = vmul.f32 0.5, %v742_v22  ;;  %v774_v21 = vpop.xlane.xlu0 %773 }
 0x150   :  { %v847_v46 = vmul.f32 0.5, %v774_v21  ;;  %v873_v21 = vadd.f32 %v1716_v61, %v1660_v41  ;;  %v905_v41 = vadd.f32 %v1716_v61, %v1668_v51 }
 0x151   :  { %v950_v24 = vsel %vm859_vm2, %v886_v5, %v815_v26  ;;  %v966_v25 = vsel %vm859_vm2, %v902_v48, %v831_v16  ;;  %v904_v5 = vadd.f32 %v1716_v61, %v1653_v31 }
 0x152   :  { %1014 = vst [vmem:[#allocation2 + $0xb0] sm:$0xff] %v950_v24  ;;  %v982_v54 = vsel %vm859_vm2, %v918_v17, %v847_v46 }
 0x153   :  { %1030 = vst [vmem:[#allocation2 + $0x130] sm:$0xff] %v966_v25 }
 0x154   :  { %1046 = vst [vmem:[#allocation2 + $0x1b0] sm:$0xff] %v982_v54  ;;  %v889_v54 = vadd.f32 %v1716_v61, %v1672_v60 }
 0x156   :  { %v712_v59 = vpop.xlane.xlu2 %711  ;;  %v680_v0 = vpop.xlane.xlu1 %679 }
 0x157   :  { %v816_v49 = vmul.f32 0.5, %v712_v59  ;;  %v800_v40 = vmul.f32 0.5, %v680_v0  ;;  %v744_v33 = vpop.xlane.xlu0 %743 }
 0x158   :  { %v832_v47 = vmul.f32 0.5, %v744_v33 }
 0x159   :  { %v951_v53 = vsel %vm859_vm2, %v887_v3, %v816_v49  ;;  %v935_v34 = vsel %vm859_vm2, %v871_v38, %v800_v40  ;;  %v921_v3 = vadd.f32 %v1716_v61, %v1675_v62  ;;  %v890_v62 = vadd.f32 %v1716_v61, %v1685_v8 }
 0x15a   :  { %1015 = vst [vmem:[#allocation2 + $0xb8] sm:$0xff] %v951_v53  ;;  %v967_v9 = vsel %vm859_vm2, %v903_v29, %v832_v47  ;;  %v874_v47 = vadd.f32 %v1716_v61, %v1683_v7 }
 0x15b   :  { %999 = vst [vmem:[#allocation2 + $0x38] sm:$0xff] %v935_v34 }
 0x15c   :  { %1031 = vst [vmem:[#allocation2 + $0x138] sm:$0xff] %v967_v9 }
 0x15e   :  { %v776_v11 = vpop.xlane.xlu1 %775  ;;  %v682_v52 = vpop.xlane.xlu2 %681 }
 0x15f   :  { %v848_v56 = vmul.f32 0.5, %v776_v11  ;;  %v801_v45 = vmul.f32 0.5, %v682_v52  ;;  %v714_v1 = vpop.xlane.xlu0 %713  ;;  %v906_v11 = vadd.f32 %v1716_v61, %v1687_v14  ;;  %v922_v14 = vadd.f32 %v1716_v61, %v1698_v28 }
 0x160   :  { %v817_v12 = vmul.f32 0.5, %v714_v1 }
 0x161   :  { %v983_v42 = vsel %vm859_vm2, %v919_v58, %v848_v56  ;;  %v936_v43 = vsel %vm859_vm2, %v872_v13, %v801_v45  ;;  %v875_v45 = vadd.f32 %v1716_v61, %v1702_v37 }
 0x162   :  { %1047 = vst [vmem:[#allocation2 + $0x1b8] sm:$0xff] %v983_v42  ;;  %v952_v19 = vsel %vm859_vm2, %v888_v10, %v817_v12  ;;  %v2088_v42 = vld [vmem:[#allocation5_spill] sm:$0xff] }
 0x163   :  { %1000 = vst [vmem:[#allocation2 + $0x40] sm:$0xff] %v936_v43  ;;  %v891_v43 = vadd.f32 %v1716_v61, %v2088_v42  ;;  %v894_v42 = vadd.f32 %v1716_v61, %v1800_v35  ;;  %v911_v35 = vadd.f32 %v1716_v61, %v1840_v4 }
 0x164   :  { %1016 = vst [vmem:[#allocation2 + $0xc0] sm:$0xff] %v952_v19 }
 0x166   :  { %v746_v20 = vpop.xlane.xlu1 %745  ;;  %v778_v22 = vpop.xlane.xlu2 %777 }
 0x167   :  { %v833_v48 = vmul.f32 0.5, %v746_v20  ;;  %v849_v26 = vmul.f32 0.5, %v778_v22  ;;  %v684_v16 = vpop.xlane.xlu0 %683 }
 0x168   :  { %v802_v17 = vmul.f32 0.5, %v684_v16 }
 0x169   :  { %v968_v46 = vsel %vm859_vm2, %v904_v5, %v833_v48  ;;  %v984_v24 = vsel %vm859_vm2, %v920_v27, %v849_v26  ;;  %v907_v27 = vadd.f32 %v1716_v61, %v1707_v50  ;;  %v923_v48 = vadd.f32 %v1716_v61, %v1728_v30 }
 0x16a   :  { %1032 = vst [vmem:[#allocation2 + $0x140] sm:$0xff] %v968_v46  ;;  %v937_v31 = vsel %vm859_vm2, %v873_v21, %v802_v17  ;;  %v2089_v17 = vld [vmem:[#allocation6_spill] sm:$0xff] }
 0x16b   :  { %1048 = vst [vmem:[#allocation2 + $0x1c0] sm:$0xff] %v984_v24  ;;  %v876_v46 = vadd.f32 %v1716_v61, %v2089_v17 }
 0x16c   :  { %1001 = vst [vmem:[#allocation2 + $0x48] sm:$0xff] %v937_v31 }
 0x16e   :  { %v716_v36 = vpop.xlane.xlu1 %715  ;;  %v748_v25 = vpop.xlane.xlu2 %747 }
 0x16f   :  { %v818_v59 = vmul.f32 0.5, %v716_v36  ;;  %v834_v0 = vmul.f32 0.5, %v748_v25  ;;  %v780_v38 = vpop.xlane.xlu0 %779 }
 0x170   :  { %v850_v49 = vmul.f32 0.5, %v780_v38 }
 0x171   :  { %v953_v40 = vsel %vm859_vm2, %v889_v54, %v818_v59  ;;  %v969_v33 = vsel %vm859_vm2, %v905_v41, %v834_v0  ;;  %v2090_v54 = vld [vmem:[#allocation7_spill] sm:$0xff]  ;;  %v2091_v59 = vld [vmem:[#allocation8_spill] sm:$0xff] }
 0x172   :  { %1017 = vst [vmem:[#allocation2 + $0xc8] sm:$0xff] %v953_v40  ;;  %v985_v60 = vsel %vm859_vm2, %v921_v3, %v850_v49  ;;  %v892_v41 = vadd.f32 %v1716_v61, %v2090_v54  ;;  %v908_v0 = vadd.f32 %v1716_v61, %v2091_v59  ;;  %v2092_v40 = vld [vmem:[#allocation9_spill] sm:$0xff] }
 0x173   :  { %1033 = vst [vmem:[#allocation2 + $0x148] sm:$0xff] %v969_v33  ;;  %v924_v33 = vadd.f32 %v1716_v61, %v2092_v40 }
 0x174   :  { %1049 = vst [vmem:[#allocation2 + $0x1c8] sm:$0xff] %v985_v60 }
 0x176   :  { %v718_v51 = vpop.xlane.xlu2 %717  ;;  %v686_v29 = vpop.xlane.xlu1 %685 }
 0x177   :  { %v819_v53 = vmul.f32 0.5, %v718_v51  ;;  %v803_v34 = vmul.f32 0.5, %v686_v29  ;;  %v750_v9 = vpop.xlane.xlu0 %749 }
 0x178   :  { %v835_v52 = vmul.f32 0.5, %v750_v9  ;;  %v893_v9 = vadd.f32 %v1716_v61, %v1767_v6 }
 0x179   :  { %v954_v58 = vsel %vm859_vm2, %v890_v62, %v819_v53  ;;  %v938_v13 = vsel %vm859_vm2, %v874_v47, %v803_v34  ;;  %v877_v34 = vadd.f32 %v1716_v61, %v1780_v39 }
 0x17a   :  { %1018 = vst [vmem:[#allocation2 + $0xd0] sm:$0xff] %v954_v58  ;;  %v970_v7 = vsel %vm859_vm2, %v906_v11, %v835_v52 }
 0x17b   :  { %1002 = vst [vmem:[#allocation2 + $0x50] sm:$0xff] %v938_v13  ;;  %v909_v13 = vadd.f32 %v1716_v61, %v1769_v15  ;;  %v878_v15 = vadd.f32 %v1716_v61, %v1810_v2 }
 0x17c   :  { %1034 = vst [vmem:[#allocation2 + $0x150] sm:$0xff] %v970_v7 }
 0x17e   :  { %v782_v8 = vpop.xlane.xlu1 %781  ;;  %v688_v56 = vpop.xlane.xlu2 %687 }
 0x17f   :  { %v851_v1 = vmul.f32 0.5, %v782_v8  ;;  %v804_v10 = vmul.f32 0.5, %v688_v56  ;;  %v720_v12 = vpop.xlane.xlu0 %719 }
 0x180   :  { %v820_v19 = vmul.f32 0.5, %v720_v12 }
 0x181   :  { %v986_v20 = vsel %vm859_vm2, %v922_v14, %v851_v1  ;;  %v939_v22 = vsel %vm859_vm2, %v875_v45, %v804_v10  ;;  %v910_v14 = vadd.f32 %v1716_v61, %v1802_v44 }
 0x182   :  { %1050 = vst [vmem:[#allocation2 + $0x1d0] sm:$0xff] %v986_v20  ;;  %v955_v37 = vsel %vm859_vm2, %v891_v43, %v820_v19 }
 0x183   :  { %1003 = vst [vmem:[#allocation2 + $0x58] sm:$0xff] %v939_v22 }
 0x184   :  { %1019 = vst [vmem:[#allocation2 + $0xd8] sm:$0xff] %v955_v37  ;;  %v895_v37 = vadd.f32 %v1716_v61, %v1838_v18 }
 0x186   :  { %v752_v28 = vpop.xlane.xlu1 %751  ;;  %v784_v5 = vpop.xlane.xlu2 %783 }
 0x187   :  { %v836_v26 = vmul.f32 0.5, %v752_v28  ;;  %v852_v16 = vmul.f32 0.5, %v784_v5  ;;  %v690_v21 = vpop.xlane.xlu0 %689 }
 0x188   :  { %v805_v24 = vmul.f32 0.5, %v690_v21 }
 0x189   :  { %v971_v31 = vsel %vm859_vm2, %v907_v27, %v836_v26  ;;  %v987_v36 = vsel %vm859_vm2, %v923_v48, %v852_v16  ;;  %v879_v48 = vadd.f32 %v1716_v61, %v1844_v63  ;;  %v925_v63 = vadd.f32 %v1716_v61, %v1804_v32 }
 0x18a   :  { %1035 = vst [vmem:[#allocation2 + $0x158] sm:$0xff] %v971_v31  ;;  %v940_v50 = vsel %vm859_vm2, %v876_v46, %v805_v24  ;;  %v926_v46 = vadd.f32 %v1716_v61, %v1836_v55 }
 0x18b   :  { %1051 = vst [vmem:[#allocation2 + $0x1d8] sm:$0xff] %v987_v36 }
 0x18c   :  { %1004 = vst [vmem:[#allocation2 + $0x60] sm:$0xff] %v940_v50  ;;  %v927_v50 = vadd.f32 %v1716_v61, %v1867_v23 }
 0x18e   :  { %v722_v30 = vpop.xlane.xlu1 %721  ;;  %v754_v25 = vpop.xlane.xlu2 %753 }
 0x18f   :  { %v821_v38 = vmul.f32 0.5, %v722_v30  ;;  %v837_v3 = vmul.f32 0.5, %v754_v25  ;;  %v786_v49 = vpop.xlane.xlu0 %785 }
 0x190   :  { %v853_v60 = vmul.f32 0.5, %v786_v49 }
 0x191   :  { %v956_v51 = vsel %vm859_vm2, %v892_v41, %v821_v38  ;;  %v972_v29 = vsel %vm859_vm2, %v908_v0, %v837_v3 }
 0x192   :  { %1020 = vst [vmem:[#allocation2 + $0xe0] sm:$0xff] %v956_v51  ;;  %v988_v47 = vsel %vm859_vm2, %v924_v33, %v853_v60 }
 0x193   :  { %1036 = vst [vmem:[#allocation2 + $0x160] sm:$0xff] %v972_v29 }
 0x194   :  { %1052 = vst [vmem:[#allocation2 + $0x1e0] sm:$0xff] %v988_v47 }
 0x196   :  { %v724_v62 = vpop.xlane.xlu2 %723  ;;  %v692_v53 = vpop.xlane.xlu1 %691 }
 0x197   :  { %v822_v11 = vmul.f32 0.5, %v724_v62  ;;  %v806_v52 = vmul.f32 0.5, %v692_v53  ;;  %v756_v58 = vpop.xlane.xlu0 %755 }
 0x198   :  { %v838_v7 = vmul.f32 0.5, %v756_v58 }
 0x199   :  { %v957_v8 = vsel %vm859_vm2, %v893_v9, %v822_v11  ;;  %v941_v56 = vsel %vm859_vm2, %v877_v34, %v806_v52 }
 0x19a   :  { %1021 = vst [vmem:[#allocation2 + $0xe8] sm:$0xff] %v957_v8  ;;  %v973_v39 = vsel %vm859_vm2, %v909_v13, %v838_v7 }
 0x19b   :  { %1005 = vst [vmem:[#allocation2 + $0x68] sm:$0xff] %v941_v56 }
 0x19c   :  { %1037 = vst [vmem:[#allocation2 + $0x168] sm:$0xff] %v973_v39 }
 0x19e   :  { %v758_v6 = vpop.xlane.xlu1 %757  ;;  %v694_v45 = vpop.xlane.xlu2 %693 }
 0x19f   :  { %v839_v1 = vmul.f32 0.5, %v758_v6  ;;  %v807_v10 = vmul.f32 0.5, %v694_v45  ;;  %v726_v12 = vpop.xlane.xlu0 %725 }
 0x1a0   :  { %v823_v43 = vmul.f32 0.5, %v726_v12 }
 0x1a1   :  { %v974_v19 = vsel %vm859_vm2, %v910_v14, %v839_v1  ;;  %v942_v20 = vsel %vm859_vm2, %v878_v15, %v807_v10 }
 0x1a2   :  { %1038 = vst [vmem:[#allocation2 + $0x170] sm:$0xff] %v974_v19  ;;  %v958_v44 = vsel %vm859_vm2, %v894_v42, %v823_v43 }
 0x1a3   :  { %1006 = vst [vmem:[#allocation2 + $0x70] sm:$0xff] %v942_v20 }
 0x1a4   :  { %1022 = vst [vmem:[#allocation2 + $0xf0] sm:$0xff] %v958_v44 }
 0x1a6   :  { %v728_v2 = vpop.xlane.xlu1 %727  ;;  %v760_v22 = vpop.xlane.xlu2 %759 }
 0x1a7   :  { %v824_v28 = vmul.f32 0.5, %v728_v2  ;;  %v840_v5 = vmul.f32 0.5, %v760_v22  ;;  %v696_v27 = vpop.xlane.xlu0 %695 }
 0x1a8   :  { %v808_v26 = vmul.f32 0.5, %v696_v27 }
 0x1a9   :  { %v959_v16 = vsel %vm859_vm2, %v895_v37, %v824_v28  ;;  %v975_v21 = vsel %vm859_vm2, %v911_v35, %v840_v5 }
 0x1aa   :  { %1023 = vst [vmem:[#allocation2 + $0xf8] sm:$0xff] %v959_v16  ;;  %v943_v18 = vsel %vm859_vm2, %v879_v48, %v808_v26 }
 0x1ab   :  { %1039 = vst [vmem:[#allocation2 + $0x178] sm:$0xff] %v975_v21 }
 0x1ac   :  { %1007 = vst [vmem:[#allocation2 + $0x78] sm:$0xff] %v943_v18 }
 0x1ae   :  { %v788_v4 = vpop.xlane.xlu1 %787  ;;  %v790_v17 = vpop.xlane.xlu2 %789 }
 0x1af   :  { %v854_v24 = vmul.f32 0.5, %v788_v4  ;;  %v855_v31 = vmul.f32 0.5, %v790_v17  ;;  %v792_v36 = vpop.xlane.xlu0 %791 }
 0x1b0   :  { %v856_v30 = vmul.f32 0.5, %v792_v36 }
 0x1b1   :  { %v989_v25 = vsel %vm859_vm2, %v925_v63, %v854_v24  ;;  %v990_v54 = vsel %vm859_vm2, %v926_v46, %v855_v31 }
 0x1b2   :  { %1053 = vst [vmem:[#allocation2 + $0x1e8] sm:$0xff] %v989_v25  ;;  %v991_v32 = vsel %vm859_vm2, %v927_v50, %v856_v30 }
 0x1b3   :  { %1054 = vst [vmem:[#allocation2 + $0x1f0] sm:$0xff] %v990_v54 }
 0x1b4   :  { %1055 = vst [vmem:[#allocation2 + $0x1f8] sm:$0xff] %v991_v32 }
 0x1b5   :  { %1068 = dma.vmem_to_hbm [thread:$0]  %s1061_s6, 8192, %s1063_s9, [#allocation3], %s1317_s4, %s1317_s4, %s1318_s10  }
 0x1b6   :  { %1314 = dma.done.wait [#allocation3], 8192  }
 0x1b7   :  { %1315 = vsyncadd [#allocation3], 4294959104 }
 0x1b8   :  { %1073 = vsyncpa [#allocation3], 1 }

</bundles_post_ra>
